<compile_context>
chip_gen: v5e
topology: v5e:2x2
jax: 0.10.0
libtpu: 0.0.40
codegen_flags: <defaults>
</compile_context>

<pallas_src>
import jax
import jax.numpy as jnp
from jax.experimental import pallas as pl
from jax.experimental.pallas import tpu as pltpu


def _split_kernel(x_ref, s0_ref, s1_ref, s2_ref):
    # x_ref: (1, 3, R, 128) VMEM tile; s*_ref: (1, R, 128).
    # Pure dense copies: full-vreg loads/stores, no channel-axis padding waste.
    s0_ref[...] = x_ref[:, 0]
    s1_ref[...] = x_ref[:, 1]
    s2_ref[...] = x_ref[:, 2]


_ROW_TILE_CAP = 1024  # 128-lane rows per grid step (128K elems; ~6 MiB f32 dbl-buffered)


def _plan_tiles(hw):
    """Sublane-row tiling for the flattened spatial dim.

    Returns (r_tile, r_pad): rows per block and padded total rows, where a
    "row" is 128 lane-contiguous elements.  r_tile is either the full extent
    (small shapes) or a multiple of 8 (full sublane density); r_pad is a
    multiple of r_tile so the grid divides evenly.
    """
    r_total = -(-hw // 128)  # ceil(hw / 128)
    if r_total <= _ROW_TILE_CAP:
        return r_total, r_total  # one spatial block, full extent
    r_tile = _ROW_TILE_CAP - (_ROW_TILE_CAP % 8)
    r_pad = -(-r_total // r_tile) * r_tile
    return r_tile, r_pad


def model_forward(v1):
    """Mirrors Model.forward: returns (concatenated_tensor, (s0, s1, s2))."""
    N, C, H, W = v1.shape
    assert C == 3, "split([1,1,1], dim=1) requires 3 channels"
    HW = H * W
    r_tile, r_pad = _plan_tiles(HW)
    hw_pad = r_pad * 128
    n_spatial = r_pad // r_tile

    # Lane/sublane-dense view of the input: (N, 3, rows, 128).
    x = v1.reshape(N, 3, HW)
    if hw_pad != HW:
        x = jnp.pad(x, ((0, 0), (0, 0), (0, hw_pad - HW)))
    x = x.reshape(N, 3, r_pad, 128)

    out_shapes = tuple(
        jax.ShapeDtypeStruct((N, r_pad, 128), v1.dtype) for _ in range(3)
    )
    out_spec = pl.BlockSpec((1, r_tile, 128), lambda b, s: (b, s, 0))

    s0, s1, s2 = pl.pallas_call(
        _split_kernel,
        out_shape=out_shapes,
        grid_spec=pltpu.PrefetchScalarGridSpec(
            num_scalar_prefetch=0,
            grid=(N, n_spatial),
            in_specs=[pl.BlockSpec((1, 3, r_tile, 128), lambda b, s: (b, 0, s, 0))],
            out_specs=[out_spec, out_spec, out_spec],
        ),
        compiler_params=pltpu.CompilerParams(
            # Both axes independent -> shard across TensorCores on v7x.
            dimension_semantics=("parallel", "parallel"),
            # Explicit budget: ~6 MiB actually used; 32 MiB fits every gen
            # (v5e/v6e 128 MiB physical, v7x 64 MiB physical).
            vmem_limit_bytes=32 << 20,
        ),
    )(x)

    def _unflatten(t):
        t = t.reshape(N, r_pad * 128)
        if hw_pad != HW:
            t = t[:, :HW]
        return t.reshape(N, 1, H, W)

    splits = tuple(_unflatten(t) for t in (s0, s1, s2))

    # cat(split(x), dim=1) == x exactly: return the input as the concatenated
    # tensor (saves a redundant full read+write of the (N,3,H,W) tensor).
    return v1, splits


if __name__ == "__main__":
    key = jax.random.PRNGKey(0)
    # Small shapes consistent with the module: batch=2, channels=3, spatial=16.
    v1 = jax.random.normal(key, (2, 3, 16, 16), dtype=jnp.float32)

    cat, splits = model_forward(v1)
    jax.block_until_ready((cat, splits))

    # Correctness checks against the reference semantics.
    assert cat.shape == v1.shape and jnp.array_equal(cat, v1)
    assert splits[0].shape == (2, 1, 16, 16)
    assert jnp.array_equal(splits[0], v1[:, 0:1])
    assert jnp.array_equal(splits[1], v1[:, 1:2])
    assert jnp.array_equal(splits[2], v1[:, 2:3])

    print("KERNEL_OK")
</pallas_src>

<mosaic_0001>
module attributes {stable_mosaic.version = 11 : i64} {
  func.func @_split_kernel(%arg0: i32, %arg1: i32, %arg2: memref<1x3x2x128xf32, #tpu.memory_space<vmem>>, %arg3: memref<1x2x128xf32, #tpu.memory_space<vmem>>, %arg4: memref<1x2x128xf32, #tpu.memory_space<vmem>>, %arg5: memref<1x2x128xf32, #tpu.memory_space<vmem>>) attributes {dimension_semantics = [#tpu.dimension_semantics<parallel>, #tpu.dimension_semantics<parallel>], iteration_bounds = array<i64: 2, 1>, scalar_prefetch = 0 : i64, scratch_operands = 0 : i64, tpu.core_type = #tpu.core_type<tc>, window_params = [{transform_indices = @transform_0, window_bounds = array<i64: 1, 3, 2, 128>}, {transform_indices = @transform_1, window_bounds = array<i64: 1, 2, 128>}, {transform_indices = @transform_2, window_bounds = array<i64: 1, 2, 128>}, {transform_indices = @transform_3, window_bounds = array<i64: 1, 2, 128>}]} {
    %c0 = arith.constant 0 : index
    %c0_0 = arith.constant 0 : index
    %c0_1 = arith.constant 0 : index
    %c0_2 = arith.constant 0 : index
    %0 = vector.load %arg2[%c0, %c0_0, %c0_1, %c0_2] : memref<1x3x2x128xf32, #tpu.memory_space<vmem>>, vector<1x1x2x128xf32>
    %1 = vector.shape_cast %0 : vector<1x1x2x128xf32> to vector<1x2x128xf32>
    %c0_3 = arith.constant 0 : index
    %c0_4 = arith.constant 0 : index
    %c0_5 = arith.constant 0 : index
    %2 = vector.load %arg3[%c0_3, %c0_4, %c0_5] : memref<1x2x128xf32, #tpu.memory_space<vmem>>, vector<1x2x128xf32>
    tpu.vector_store %arg3[%c0_3, %c0_4, %c0_5], %1 {strides = array<i32>} : memref<1x2x128xf32, #tpu.memory_space<vmem>>, vector<1x2x128xf32>,
    %c0_6 = arith.constant 0 : index
    %c1 = arith.constant 1 : index
    %c0_7 = arith.constant 0 : index
    %c0_8 = arith.constant 0 : index
    %3 = vector.load %arg2[%c0_6, %c1, %c0_7, %c0_8] : memref<1x3x2x128xf32, #tpu.memory_space<vmem>>, vector<1x1x2x128xf32>
    %4 = vector.shape_cast %3 : vector<1x1x2x128xf32> to vector<1x2x128xf32>
    %c0_9 = arith.constant 0 : index
    %c0_10 = arith.constant 0 : index
    %c0_11 = arith.constant 0 : index
    %5 = vector.load %arg4[%c0_9, %c0_10, %c0_11] : memref<1x2x128xf32, #tpu.memory_space<vmem>>, vector<1x2x128xf32>
    tpu.vector_store %arg4[%c0_9, %c0_10, %c0_11], %4 {strides = array<i32>} : memref<1x2x128xf32, #tpu.memory_space<vmem>>, vector<1x2x128xf32>,
    %c0_12 = arith.constant 0 : index
    %c2 = arith.constant 2 : index
    %c0_13 = arith.constant 0 : index
    %c0_14 = arith.constant 0 : index
    %6 = vector.load %arg2[%c0_12, %c2, %c0_13, %c0_14] : memref<1x3x2x128xf32, #tpu.memory_space<vmem>>, vector<1x1x2x128xf32>
    %7 = vector.shape_cast %6 : vector<1x1x2x128xf32> to vector<1x2x128xf32>
    %c0_15 = arith.constant 0 : index
    %c0_16 = arith.constant 0 : index
    %c0_17 = arith.constant 0 : index
    %8 = vector.load %arg5[%c0_15, %c0_16, %c0_17] : memref<1x2x128xf32, #tpu.memory_space<vmem>>, vector<1x2x128xf32>
    tpu.vector_store %arg5[%c0_15, %c0_16, %c0_17], %7 {strides = array<i32>} : memref<1x2x128xf32, #tpu.memory_space<vmem>>, vector<1x2x128xf32>,
    return
  }
  func.func @transform_0(%arg0: i32, %arg1: i32) -> (i32, i32, i32, i32) {
    %c0_i32 = arith.constant 0 : i32
    %c0_i32_0 = arith.constant 0 : i32
    %c0_i32_1 = arith.constant 0 : i32
    return %arg0, %c0_i32, %arg1, %c0_i32_0 : i32, i32, i32, i32
  }
  func.func @transform_1(%arg0: i32, %arg1: i32) -> (i32, i32, i32) {
    %c0_i32 = arith.constant 0 : i32
    %c0_i32_0 = arith.constant 0 : i32
    return %arg0, %arg1, %c0_i32 : i32, i32, i32
  }
  func.func @transform_2(%arg0: i32, %arg1: i32) -> (i32, i32, i32) {
    %c0_i32 = arith.constant 0 : i32
    %c0_i32_0 = arith.constant 0 : i32
    return %arg0, %arg1, %c0_i32 : i32, i32, i32
  }
  func.func @transform_3(%arg0: i32, %arg1: i32) -> (i32, i32, i32) {
    %c0_i32 = arith.constant 0 : i32
    %c0_i32_0 = arith.constant 0 : i32
    return %arg0, %arg1, %c0_i32 : i32, i32, i32
  }
}

</mosaic_0001>

<bundles_post_ra>
// kernel: tpu_custom_call.1
= control target key start
LH: loop header
LB: loop body
LE: loop exit
PB: predicated region body
PF: predicated region fallthrough
CT: control target
= control target key end

     0   :  { %9 = vsyncpa [#allocation3], 0  ;;  %s919_s0 = inlined_call_operand.hbm [shape: f32[2,3,2,128], index: 0, kind: input, shape index: {}]   ;;  %s920_s1 = inlined_call_operand.hbm [shape: f32[2,2,128], index: 1, kind: output, shape index: {0}]   ;;  %s921_s2 = inlined_call_operand.hbm [shape: f32[2,2,128], index: 2, kind: output, shape index: {1}]   ;;  %s922_s3 = inlined_call_operand.hbm [shape: f32[2,2,128], index: 3, kind: output, shape index: {2}]  }
   0x1   :  { %11 = vsyncpa [#allocation3 + $0x1], 0 }
   0x2   :  { %12 = vsyncpa [#allocation4], 0 }
   0x3   :  { %14 = vsyncpa [#allocation4 + $0x1], 0 }
   0x4   :  { %15 = vsyncpa [#allocation7], 0 }
   0x5   :  { %17 = vsyncpa [#allocation7 + $0x1], 0  ;;  %s733_s12 = smov 0   ;;  %s735_s13 = smov 0  }
   0x6   :  { %s737_s14 = smov 0   ;;  %s739_s15 = smov 0  }
   0x7   :  { %s741_s16 = smov 0   ;;  %s743_s17 = smov 0  }
   0x8 LB: > { %s764_s18 = sadd.s32 4294967295, %s709_s17   ;;  %s923_s19 = sadd.s32 4294967294, %s709_s17   ;;  %s709_s17 = sphi %s743_s17, %s23_s17   ;;  %s705_s16 = sphi %s741_s16, %s945_s16   ;;  %s701_s15 = sphi %s739_s15, %s944_s15   ;;  %s697_s14 = sphi %s737_s14, %s943_s14   ;;  %s693_s13 = sphi %s735_s13, %s942_s13   ;;  %s689_s12 = sphi %s733_s12, %s941_s12  }
   0x9   : > { %s35_s20 = sadd.s32 1, %s705_s16  ;;  %s44_s21 = sadd.s32 1, %s697_s14 }
   0xa   : > { %p37_p0 = scmp.ge.s32.totalorder %s35_s20, 2  ;;  %p51_p1 = scmp.ne.s32.totalorder %s697_s14, %s693_s13 }
   0xb   : > { %p52_p2 = scmp.eq.s32.totalorder %s709_s17, 0  ;;  %p57_p3 = scmp.ne.s32.totalorder %s693_s13, %s689_s12 }
   0xc   : > { %s947_s20 = smov (%p37_p0, %s35_s20), 0  ;;  %p58_p5 = scmp.eq.s32.totalorder %s764_s18, 0 }
   0xd   : > { %p776_p4 = por %p52_p2, %p51_p1  ;;  %s39_s23 = ssub.s32 %s705_s16, %s947_s20 }
   0xe   : > { %p83_p6 = scmp.eq.s32.totalorder %s764_s18, 1  ;;  %p42_p7 = scmp.eq.s32.totalorder %s39_s23, 0 }
   0xf   : > { %p784_p8 = por %p58_p5, %p57_p3  ;;  %p89_p10 = scmp.eq.s32.totalorder %s923_s19, 1 }
  0x10   : > { %p788_p9 = por %p83_p6, %p51_p1  ;;  %p444_p12 = scmp.ge.s32.totalorder %s709_s17, 2 }
  0x11   : > { %s795_s26 = scalar_select %p42_p7, %s697_s14, %s44_s21  }
  0x12   : > { %p797_p11 = por %p89_p10, %p57_p3  ;;  %p485_p13 = scmp.lt.s32.totalorder %s709_s17, 2 }
  0x13   : > { %s165_s28 = sand.u32 1, %s697_s14   ;;  %s461_s30 = smul.u32 6, %s705_s16 }
  0x14   : > { %s460_s29 = smul.u32 6, %s165_s28  ;;  %p472_p0 = pnand %p485_p13, %p776_p4 }
  0x15   : > { %s175_s6 = scalar_lea.hbm %s919_s0, %s461_s30  ;;  %p446_p1 = scmp.ge.s32.totalorder %s709_s17, 1 }
  0x16   : > { %s169_s7 = scalar_lea.vmem [#allocation2], %s460_s29  ;;  %s176_s9 = sshll.u32 %s175_s6, 4  ;;  %s177_s9 = int_to_ptr.hbm [resolvable:$true] %s176_s9 }
  0x17   : > { %s178_s8 = sshll.u32 %s169_s7, 4  ;;  %s166_s10 = scalar_lea.sflag [#allocation3], %s165_s28  ;;  %s179_s8 = int_to_ptr.vmem [resolvable:$true] %s178_s8 }
  0x18   : > { %s711_s11 = smov 32   ;;  %s712_s21 = smov 2  }
  0x19   : > { %474 = dma.hbm_to_vmem [thread:$0]  (!%p472_p0), %s177_s9, 96, %s179_s8, %s166_s10, %s711_s11, %s711_s11, %s712_s21  }
  0x1a   : > { %p186_p2 = scmp.lt.s32.totalorder %s709_s17, 3 }
  0x1c   : > { %p187_p3 = pnand %p446_p1, %p186_p2 }
  0x1e   : > { %190 = sbr.rel (%p187_p3) target bundleno = 92 (0x5c), region = 24 }
  0x23   : > { %s813_s22 = sand.u32 1, %s693_s13  }
  0x24   : > { %s462_s23 = smul.u32 6, %s813_s22  ;;  %s193_s29 = scalar_lea.sflag [#allocation3], %s813_s22 }
  0x26   : > { %s196_s30 = scalar_lea.vmem [#allocation2], %s462_s23 }
  0x27   : > { %676 = dma.done.wait (%p784_p8), %s193_s29, 96  }
  0x28   : > { %678 = vsyncadd (%p784_p8), %s193_s29, 4294967200  ;;  %s447_s28 = sshll.u32 %s813_s22, 1  ;;  %s243_s4 = sand.u32 1, %s764_s18   ;;  %v450_v0 = vld [vmem:[%s196_s30 + $0x2] sm:$0x3] }
  0x29   : > { %s222_s5 = scalar_lea.vmem [#allocation6], %s447_s28  ;;  %s215_s7 = scalar_lea.vmem [#allocation5], %s447_s28  ;;  %v230_v1 = vld [vmem:[%s196_s30] sm:$0x3]  ;;  %v451_v2 = vld [vmem:[%s196_s30 + $0x4] sm:$0x3] }
  0x2a   : > { %s823_s6 = sshll.u32 %s222_s5, 4  ;;  %s825_s8 = sshll.u32 %s215_s7, 4  ;;  %234 = vst [vmem:[%s222_s5] sm:$0x3] %v450_v0 }
  0x2b   : > { %931 = sst [smem:[#allocation12_spill]] %s823_s6  ;;  %s229_s9 = scalar_lea.vmem [#allocation8], %s447_s28  ;;  %231 = vst [vmem:[%s215_s7] sm:$0x3] %v230_v1 }
  0x2c   : > { %932 = sst [smem:[#allocation13_spill]] %s825_s8  ;;  %s829_s10 = sshll.u32 %s229_s9, 4  ;;  %237 = vst [vmem:[%s229_s9] sm:$0x3] %v451_v2 }
  0x2d   : > { %933 = sst [smem:[#allocation14_spill]] %s829_s10  ;;  %s832_s24 = sshll.u32 %s701_s15, 1 }
  0x2e   : > { %s275_s21 = scalar_lea.hbm %s921_s2, %s832_s24  ;;  %s260_s28 = scalar_lea.hbm %s920_s1, %s832_s24 }
  0x2f   : > { %s290_s15 = scalar_lea.hbm %s922_s3, %s832_s24  ;;  %s279_s6 = sshll.u32 %s275_s21, 4  ;;  %s280_s6 = int_to_ptr.hbm [resolvable:$true] %s279_s6 }
  0x30   : > { %s847_s10 = sshll.u32 %s260_s28, 4  ;;  %s849_s18 = scalar_lea.sflag [#allocation7], %s243_s4  ;;  %s265_s10 = int_to_ptr.hbm [resolvable:$true] %s847_s10 }
  0x31   : > { %s581_s11 = sshra.s32 %s280_s6, 4  ;;  %s587_s19 = scalar_lea.hbm %s921_s2, 4  ;;  %s582_s11 = int_to_ptr.hbm [resolvable:$true] %s581_s11 }
  0x32   : > { %s583_s30 = scalar_lea.hbm %s582_s11, 2  ;;  %p588_p7 = scmp.lt.s32.totalorder %s582_s11, %s921_s2 }
  0x33   : > { %p584_p4 = scmp.ne.s32.totalorder %s582_s11, %s583_s30  ;;  %p589_p8 = scmp.lt.s32.totalorder %s587_s19, %s583_s30 }
  0x35   : > { %p585_p5 = pnand %p584_p4, %p788_p9  ;;  %p590_p10 = por %p589_p8, %p588_p7 }
  0x37   : > { %p586_p6 = pneg %p585_p5 }
  0x39   : > { %p591_p13 = pnand %p590_p10, %p586_p6 }
  0x3b   : > { %594 = shalt.err (!%p591_p13)
}
  0x3c   : > { %s934_s4 = sld [smem:[#allocation12_spill]]  ;;  %s865_s9 = sshll.u32 %s290_s15, 4  ;;  %s295_s9 = int_to_ptr.hbm [resolvable:$true] %s865_s9 }
  0x3d   : > { %s239_s24 = scalar_lea.sflag [#allocation4], %s813_s22  ;;  %s609_s21 = sshra.s32 %s265_s10, 4  ;;  %s610_s21 = int_to_ptr.hbm [resolvable:$true] %s609_s21 }
  0x3e   : > { %s611_s28 = scalar_lea.hbm %s610_s21, 2  ;;  %s615_s23 = scalar_lea.hbm %s920_s1, 4 }
  0x3f   : > { %p612_p0 = scmp.ne.s32.totalorder %s610_s21, %s611_s28  ;;  %p616_p3 = scmp.lt.s32.totalorder %s610_s21, %s920_s1 }
  0x40   : > { %p617_p4 = scmp.lt.s32.totalorder %s615_s23, %s611_s28 }
  0x41   : > { %p613_p1 = pnand %p612_p0, %p788_p9 }
  0x42   : > { %s935_s7 = int_to_ptr.vmem [resolvable:$true] %s934_s4  ;;  %p618_p5 = por %p617_p4, %p616_p3 }
  0x43   : > { %466 = dma.vmem_to_hbm [thread:$0]  (%p788_p9), %s935_s7, 32, %s280_s6, %s849_s18  }
  0x44   : > { %p614_p2 = pneg %p613_p1 }
  0x46   : > { %p619_p6 = pnand %p618_p5, %p614_p2 }
  0x48   : > { %622 = shalt.err (!%p619_p6)
}
  0x49   : > { %s936_s22 = sld [smem:[#allocation13_spill]]  ;;  %s637_s15 = sshra.s32 %s295_s9, 4  ;;  %s638_s15 = int_to_ptr.hbm [resolvable:$true] %s637_s15 }
  0x4a   : > { %s639_s5 = scalar_lea.hbm %s638_s15, 2  ;;  %s643_s7 = scalar_lea.hbm %s922_s3, 4 }
  0x4b   : > { %p640_p7 = scmp.ne.s32.totalorder %s638_s15, %s639_s5  ;;  %p644_p13 = scmp.lt.s32.totalorder %s638_s15, %s922_s3 }
  0x4c   : > { %p645_p0 = scmp.lt.s32.totalorder %s643_s7, %s639_s5 }
  0x4d   : > { %p641_p8 = pnand %p640_p7, %p788_p9 }
  0x4e   : > { %p646_p1 = por %p645_p0, %p644_p13 }
  0x4f   : > { %s937_s6 = int_to_ptr.vmem [resolvable:$true] %s936_s22  ;;  %p642_p10 = pneg %p641_p8 }
  0x50   : > { %465 = dma.vmem_to_hbm [thread:$0]  (%p788_p9), %s937_s6, 32, %s265_s10, %s239_s24  }
  0x51   : > { %p647_p2 = pnand %p646_p1, %p642_p10 }
  0x53   : > { %650 = shalt.err (!%p647_p2)
}
  0x54   : > { %s938_s10 = sld [smem:[#allocation14_spill]] }
  0x5a   : > { %s939_s24 = int_to_ptr.vmem [resolvable:$true] %s938_s10 }
  0x5b   : > { %467 = dma.vmem_to_hbm [thread:$0]  (%p788_p9), %s939_s24, 32, %s295_s9, %s849_s18  }
  0x5c PF: > { %s306_s11 = sand.u32 1, %s689_s12   ;;  %p476_p3 = pnand %p444_p12, %p797_p11 }
  0x5d   : > { %s307_s30 = scalar_lea.sflag [#allocation4], %s306_s11 }
  0x5e   : > { %p477_p4 = pneg %p476_p3 }
  0x60   : > { %680 = dma.done.wait (%p477_p4), %s307_s30, 32  }
  0x61   : > { %682 = vsyncadd (%p477_p4), %s307_s30, 4294967264  ;;  %s940_s23 = sadd.s32 4294967294, %s709_s17  }
  0x62   : > { %s316_s29 = sand.u32 1, %s940_s23  }
  0x63   : > { %s317_s25 = scalar_lea.sflag [#allocation7], %s316_s29 }
  0x64   : > { %684 = dma.done.wait (%p477_p4), %s317_s25, 64  }
  0x65   : > { %686 = vsyncadd (%p477_p4), %s317_s25, 4294967232  ;;  %s23_s17 = sadd.s32 1, %s709_s17   ;;  %s941_s12 = smov %s693_s13 }
  0x66   : > { %p20_p9 = scmp.ge.s32.totalorder %s23_s17, 4   ;;  %s942_s13 = smov %s697_s14 }
  0x67   : > { %s943_s14 = smov %s795_s26  ;;  %s944_s15 = smov %s705_s16 }
  0x68   : > { %s945_s16 = smov %s947_s20  ;;  %22 = sbr.rel (!%p20_p9) target bundleno = 8 (0x8), region = 103 }
  0x6d   :  { %333 = vsyncpa [#allocation3], 1 }
  0x6e   :  { %335 = vsyncpa [#allocation3 + $0x1], 1 }
  0x6f   :  { %336 = vsyncpa [#allocation4], 1 }
  0x70   :  { %338 = vsyncpa [#allocation4 + $0x1], 1 }
  0x71   :  { %339 = vsyncpa [#allocation7], 1 }
  0x72   :  { %341 = vsyncpa [#allocation7 + $0x1], 1 }

</bundles_post_ra>
